<compile_context>
chip_gen: v5e
topology: v5e:2x2
jax: 0.10.0
libtpu: 0.0.40
codegen_flags: <defaults>
</compile_context>

<pallas_src>
import functools

import jax
import jax.numpy as jnp
from jax.experimental import pallas as pl
from jax.experimental.pallas import tpu as pltpu


# ----------------------------- Pallas kernel --------------------------------

def _spatial_attention_kernel(xp_ref, wpe_ref, pos_ref, wqkv_ref, wproj_ref,
                              out_ref, *, num_heads, head_dim, scale):
    """Whole SpatialAttention forward for one batch element, VMEM-resident.

    xp_ref   : (1, P, Dp)  patchified input (Dp = C*ps*ps)
    wpe_ref  : (Dp, E)     patch-embed conv expressed as a matmul
    pos_ref  : (P, E)      positional embedding
    wqkv_ref : (E, 3E)     fused Q|K|V projection weights (lane-dense)
    wproj_ref: (E, E)      output projection
    out_ref  : (1, P, Dp)  x_patches * sigmoid(gate)   (per-patch rescale)
    """
    E = num_heads * head_dim
    xp = xp_ref[0]                                                  # (P, Dp)

    # patch embed + positional embedding (fused epilogue, stays in VMEM)
    patches = jnp.dot(xp, wpe_ref[...],
                      preferred_element_type=jnp.float32) + pos_ref[...]

    # fused Q/K/V projection: one lane-dense (P, 3E) matmul on the shared input
    qkv = jnp.dot(patches, wqkv_ref[...],
                  preferred_element_type=jnp.float32)               # (P, 3E)

    # Multi-head attention, heads statically unrolled.  The output projection
    # is accumulated per head (out_h @ Wproj[rows of head h]) so the
    # concat-over-heads tensor never materializes.
    proj = jnp.zeros((patches.shape[0], E), jnp.float32)
    for h in range(num_heads):
        lo = h * head_dim
        hi = lo + head_dim
        q_h = qkv[:, lo:hi]                                         # (P, hd)
        k_h = qkv[:, E + lo:E + hi]                                 # (P, hd)
        v_h = qkv[:, 2 * E + lo:2 * E + hi]                         # (P, hd)

        scores = jax.lax.dot_general(
            q_h, k_h, (((1,), (1,)), ((), ())),
            preferred_element_type=jnp.float32) * scale             # (P, P)
        scores = scores - jnp.max(scores, axis=-1, keepdims=True)
        p_un = jnp.exp(scores)
        probs = p_un / jnp.sum(p_un, axis=-1, keepdims=True)
        # TODO(synk): attn_dropout omitted (dropout_rate=0.0 / inference mode).

        attn_h = jnp.dot(probs, v_h,
                         preferred_element_type=jnp.float32)        # (P, hd)
        proj = proj + jnp.dot(attn_h, wproj_ref[lo:hi, :],
                              preferred_element_type=jnp.float32)   # (P, E)

    # per-patch gate: mean over embed dim, then sigmoid
    m = jnp.mean(proj, axis=-1, keepdims=True)                      # (P, 1)
    gate = 1.0 / (1.0 + jnp.exp(-m))

    # sigmoid map -> nearest-neighbour upsample -> x * attn_map collapses to a
    # per-row scale of the patchified input (each row holds one ps x ps patch
    # of every channel), so the final module output is written directly here.
    out_ref[0] = xp * gate


# ------------------------------ wrapper --------------------------------------

def spatial_attention(x, params, *, patch_size, num_heads):
    B, C, H, W = x.shape
    ps = patch_size
    gh, gw = H // ps, W // ps
    P = gh * gw
    Dp = C * ps * ps
    E = params['w_qkv'].shape[0]
    head_dim = E // num_heads
    scale = head_dim ** -0.5

    # NCHW -> (B, P, C*ps*ps): row p = patch (i, j), columns ordered (C, kh, kw)
    # to match Conv2d(weight[(o), c, kh, kw]) flattening.
    xp = x.reshape(B, C, gh, ps, gw, ps)
    xp = jnp.transpose(xp, (0, 2, 4, 1, 3, 5)).reshape(B, P, Dp)
    xp = xp.astype(jnp.float32)

    kernel = functools.partial(_spatial_attention_kernel,
                               num_heads=num_heads, head_dim=head_dim,
                               scale=scale)

    out_p = pl.pallas_call(
        kernel,
        out_shape=jax.ShapeDtypeStruct((B, P, Dp), jnp.float32),
        grid_spec=pltpu.PrefetchScalarGridSpec(
            num_scalar_prefetch=0,
            grid=(B,),
            in_specs=[
                pl.BlockSpec((1, P, Dp), lambda b: (b, 0, 0)),   # x patches
                pl.BlockSpec((Dp, E), lambda b: (0, 0)),         # w_pe
                pl.BlockSpec((P, E), lambda b: (0, 0)),          # pos_embed
                pl.BlockSpec((E, 3 * E), lambda b: (0, 0)),      # w_qkv
                pl.BlockSpec((E, E), lambda b: (0, 0)),          # w_proj
            ],
            out_specs=pl.BlockSpec((1, P, Dp), lambda b: (b, 0, 0)),
        ),
        compiler_params=pltpu.CompilerParams(
            dimension_semantics=("parallel",)),
    )(xp, params['w_pe'], params['pos'], params['w_qkv'], params['w_proj'])

    # (B, P, Dp) patch slabs -> NCHW
    out = out_p.reshape(B, gh, gw, C, ps, ps)
    out = jnp.transpose(out, (0, 3, 1, 4, 2, 5)).reshape(B, C, H, W)
    return out


# -------------------------- pure-JAX reference -------------------------------

def spatial_attention_ref(x, params, *, patch_size, num_heads):
    B, C, H, W = x.shape
    ps = patch_size
    gh, gw = H // ps, W // ps
    P = gh * gw
    Dp = C * ps * ps
    E = params['w_qkv'].shape[0]
    hd = E // num_heads

    xp = x.reshape(B, C, gh, ps, gw, ps)
    xp = jnp.transpose(xp, (0, 2, 4, 1, 3, 5)).reshape(B, P, Dp)
    patches = xp @ params['w_pe'] + params['pos'][None]
    qkv = patches @ params['w_qkv']
    q, k, v = qkv[..., :E], qkv[..., E:2 * E], qkv[..., 2 * E:]
    q = q.reshape(B, P, num_heads, hd).transpose(0, 2, 1, 3)
    k = k.reshape(B, P, num_heads, hd).transpose(0, 2, 1, 3)
    v = v.reshape(B, P, num_heads, hd).transpose(0, 2, 1, 3)
    scores = jnp.einsum('bhpd,bhqd->bhpq', q, k) * (hd ** -0.5)
    probs = jax.nn.softmax(scores, axis=-1)
    ao = jnp.einsum('bhpq,bhqd->bhpd', probs, v)
    ao = ao.transpose(0, 2, 1, 3).reshape(B, P, E)
    proj = ao @ params['w_proj']
    gate = jax.nn.sigmoid(jnp.mean(proj, axis=-1, keepdims=True))   # (B, P, 1)
    out_p = xp * gate
    out = out_p.reshape(B, gh, gw, C, ps, ps)
    return jnp.transpose(out, (0, 3, 1, 4, 2, 5)).reshape(B, C, H, W)


# -------------------------- deterministic params ------------------------------

def make_params(key, in_channels, embed_dim, patch_size, num_patches):
    Dp = in_channels * patch_size * patch_size
    ks = jax.random.split(key, 6)
    w = lambda kk, *s: (0.1 * jax.random.normal(kk, s)).astype(jnp.float32)
    wq = w(ks[0], embed_dim, embed_dim)
    wk = w(ks[1], embed_dim, embed_dim)
    wv = w(ks[2], embed_dim, embed_dim)
    return {
        'w_pe':   w(ks[3], Dp, embed_dim),                         # Conv2d(ps, s=ps) as matmul
        'pos':    (0.02 * jax.random.normal(ks[4], (num_patches, embed_dim))
                   ).astype(jnp.float32),
        'w_qkv':  jnp.concatenate([wq, wk, wv], axis=1),           # fused (E, 3E)
        'w_proj': w(ks[5], embed_dim, embed_dim),
    }


# --------------------------------- main ---------------------------------------

if __name__ == "__main__":
    in_channels, window_size, embed_dim, patch_size, num_heads = 4, 16, 32, 4, 4
    B = 2
    num_patches = (window_size // patch_size) ** 2

    key = jax.random.PRNGKey(0)
    kx, kp = jax.random.split(key)
    x = jax.random.normal(kx, (B, in_channels, window_size, window_size),
                          dtype=jnp.float32)                       # NCHW input
    params = make_params(kp, in_channels, embed_dim, patch_size, num_patches)

    fwd = jax.jit(functools.partial(spatial_attention,
                                    patch_size=patch_size, num_heads=num_heads))
    out = fwd(x, params)
    jax.block_until_ready(out)

    ref = spatial_attention_ref(x, params, patch_size=patch_size,
                                num_heads=num_heads)
    jax.block_until_ready(ref)

    assert out.shape == x.shape
    assert bool(jnp.all(jnp.isfinite(out)))
    assert bool(jnp.allclose(out, ref, atol=5e-3, rtol=5e-3))
    print("KERNEL_OK")
</pallas_src>

<mosaic_0001>
module attributes {stable_mosaic.version = 11 : i64} {
  func.func @_spatial_attention_kernel(%arg0: i32, %arg1: memref<1x16x64xf32, #tpu.memory_space<vmem>>, %arg2: memref<64x32xf32, #tpu.memory_space<vmem>>, %arg3: memref<16x32xf32, #tpu.memory_space<vmem>>, %arg4: memref<32x96xf32, #tpu.memory_space<vmem>>, %arg5: memref<32x32xf32, #tpu.memory_space<vmem>>, %arg6: memref<1x16x64xf32, #tpu.memory_space<vmem>>) attributes {dimension_semantics = [#tpu.dimension_semantics<parallel>], iteration_bounds = array<i64: 2>, scalar_prefetch = 0 : i64, scratch_operands = 0 : i64, tpu.core_type = #tpu.core_type<tc>, window_params = [{transform_indices = @transform_0, window_bounds = array<i64: 1, 16, 64>}, {pipeline_mode = #tpu.pipeline_mode<synchronous>, transform_indices = @transform_1, window_bounds = array<i64: 64, 32>}, {pipeline_mode = #tpu.pipeline_mode<synchronous>, transform_indices = @transform_2, window_bounds = array<i64: 16, 32>}, {pipeline_mode = #tpu.pipeline_mode<synchronous>, transform_indices = @transform_3, window_bounds = array<i64: 32, 96>}, {pipeline_mode = #tpu.pipeline_mode<synchronous>, transform_indices = @transform_4, window_bounds = array<i64: 32, 32>}, {transform_indices = @transform_5, window_bounds = array<i64: 1, 16, 64>}]} {
    %c0 = arith.constant 0 : index
    %c0_0 = arith.constant 0 : index
    %c0_1 = arith.constant 0 : index
    %0 = vector.load %arg1[%c0, %c0_0, %c0_1] : memref<1x16x64xf32, #tpu.memory_space<vmem>>, vector<1x16x64xf32>
    %1 = vector.shape_cast %0 : vector<1x16x64xf32> to vector<16x64xf32>
    %c0_2 = arith.constant 0 : index
    %c0_3 = arith.constant 0 : index
    %2 = vector.load %arg2[%c0_2, %c0_3] : memref<64x32xf32, #tpu.memory_space<vmem>>, vector<64x32xf32>
    %cst = arith.constant dense<0.000000e+00> : vector<16x32xf32>
    %3 = tpu.matmul %1, %2, %cst {dimension_numbers = #tpu.dot_dimension_numbers<[1], [0], [0], [1], [0, 0, 1, 1], [], []>} : vector<16x64xf32>, vector<64x32xf32>, vector<16x32xf32> -> vector<16x32xf32>
    %c0_4 = arith.constant 0 : index
    %c0_5 = arith.constant 0 : index
    %4 = vector.load %arg3[%c0_4, %c0_5] : memref<16x32xf32, #tpu.memory_space<vmem>>, vector<16x32xf32>
    %5 = arith.addf %3, %4 : vector<16x32xf32>
    %c0_6 = arith.constant 0 : index
    %c0_7 = arith.constant 0 : index
    %6 = vector.load %arg4[%c0_6, %c0_7] : memref<32x96xf32, #tpu.memory_space<vmem>>, vector<32x96xf32>
    %cst_8 = arith.constant dense<0.000000e+00> : vector<16x96xf32>
    %7 = tpu.matmul %5, %6, %cst_8 {dimension_numbers = #tpu.dot_dimension_numbers<[1], [0], [0], [1], [0, 0, 1, 1], [], []>} : vector<16x32xf32>, vector<32x96xf32>, vector<16x96xf32> -> vector<16x96xf32>
    %cst_9 = arith.constant 0.000000e+00 : f32
    %8 = vector.broadcast %cst_9 : f32 to vector<16x32xf32>
    %9 = vector.extract_strided_slice %7 {offsets = [0, 0], sizes = [16, 8], strides = [1, 1]} : vector<16x96xf32> to vector<16x8xf32>
    %10 = vector.extract_strided_slice %7 {offsets = [0, 32], sizes = [16, 8], strides = [1, 1]} : vector<16x96xf32> to vector<16x8xf32>
    %11 = vector.extract_strided_slice %7 {offsets = [0, 64], sizes = [16, 8], strides = [1, 1]} : vector<16x96xf32> to vector<16x8xf32>
    %cst_10 = arith.constant dense<0.000000e+00> : vector<16x16xf32>
    %12 = tpu.matmul %9, %10, %cst_10 {dimension_numbers = #tpu.dot_dimension_numbers<[1], [1], [0], [0], [0, 0, 1, 0], [], []>} : vector<16x8xf32>, vector<16x8xf32>, vector<16x16xf32> -> vector<16x16xf32>
    %cst_11 = arith.constant 0.353553385 : f32
    %13 = vector.broadcast %cst_11 : f32 to vector<16x16xf32>
    %14 = arith.mulf %12, %13 : vector<16x16xf32>
    %cst_12 = arith.constant dense<0xFF800000> : vector<16xf32>
    %15 = vector.multi_reduction <maximumf>, %14, %cst_12 [1] : vector<16x16xf32> to vector<16xf32>
    %16 = vector.shape_cast %15 : vector<16xf32> to vector<16x1xf32>
    %17 = vector.broadcast %16 : vector<16x1xf32> to vector<16x16xf32>
    %18 = arith.subf %14, %17 : vector<16x16xf32>
    %19 = math.exp %18 : vector<16x16xf32>
    %cst_13 = arith.constant dense<0.000000e+00> : vector<16xf32>
    %20 = vector.multi_reduction <add>, %19, %cst_13 [1] : vector<16x16xf32> to vector<16xf32>
    %21 = vector.shape_cast %20 : vector<16xf32> to vector<16x1xf32>
    %22 = vector.broadcast %21 : vector<16x1xf32> to vector<16x16xf32>
    %23 = arith.divf %19, %22 : vector<16x16xf32>
    %cst_14 = arith.constant dense<0.000000e+00> : vector<16x8xf32>
    %24 = tpu.matmul %23, %11, %cst_14 {dimension_numbers = #tpu.dot_dimension_numbers<[1], [0], [0], [1], [0, 0, 1, 1], [], []>} : vector<16x16xf32>, vector<16x8xf32>, vector<16x8xf32> -> vector<16x8xf32>
    %c0_15 = arith.constant 0 : index
    %c0_16 = arith.constant 0 : index
    %25 = vector.load %arg5[%c0_15, %c0_16] : memref<32x32xf32, #tpu.memory_space<vmem>>, vector<8x32xf32>
    %cst_17 = arith.constant dense<0.000000e+00> : vector<16x32xf32>
    %26 = tpu.matmul %24, %25, %cst_17 {dimension_numbers = #tpu.dot_dimension_numbers<[1], [0], [0], [1], [0, 0, 1, 1], [], []>} : vector<16x8xf32>, vector<8x32xf32>, vector<16x32xf32> -> vector<16x32xf32>
    %27 = arith.addf %8, %26 : vector<16x32xf32>
    %28 = vector.extract_strided_slice %7 {offsets = [0, 8], sizes = [16, 8], strides = [1, 1]} : vector<16x96xf32> to vector<16x8xf32>
    %29 = vector.extract_strided_slice %7 {offsets = [0, 40], sizes = [16, 8], strides = [1, 1]} : vector<16x96xf32> to vector<16x8xf32>
    %30 = vector.extract_strided_slice %7 {offsets = [0, 72], sizes = [16, 8], strides = [1, 1]} : vector<16x96xf32> to vector<16x8xf32>
    %cst_18 = arith.constant dense<0.000000e+00> : vector<16x16xf32>
    %31 = tpu.matmul %28, %29, %cst_18 {dimension_numbers = #tpu.dot_dimension_numbers<[1], [1], [0], [0], [0, 0, 1, 0], [], []>} : vector<16x8xf32>, vector<16x8xf32>, vector<16x16xf32> -> vector<16x16xf32>
    %cst_19 = arith.constant 0.353553385 : f32
    %32 = vector.broadcast %cst_19 : f32 to vector<16x16xf32>
    %33 = arith.mulf %31, %32 : vector<16x16xf32>
    %cst_20 = arith.constant dense<0xFF800000> : vector<16xf32>
    %34 = vector.multi_reduction <maximumf>, %33, %cst_20 [1] : vector<16x16xf32> to vector<16xf32>
    %35 = vector.shape_cast %34 : vector<16xf32> to vector<16x1xf32>
    %36 = vector.broadcast %35 : vector<16x1xf32> to vector<16x16xf32>
    %37 = arith.subf %33, %36 : vector<16x16xf32>
    %38 = math.exp %37 : vector<16x16xf32>
    %cst_21 = arith.constant dense<0.000000e+00> : vector<16xf32>
    %39 = vector.multi_reduction <add>, %38, %cst_21 [1] : vector<16x16xf32> to vector<16xf32>
    %40 = vector.shape_cast %39 : vector<16xf32> to vector<16x1xf32>
    %41 = vector.broadcast %40 : vector<16x1xf32> to vector<16x16xf32>
    %42 = arith.divf %38, %41 : vector<16x16xf32>
    %cst_22 = arith.constant dense<0.000000e+00> : vector<16x8xf32>
    %43 = tpu.matmul %42, %30, %cst_22 {dimension_numbers = #tpu.dot_dimension_numbers<[1], [0], [0], [1], [0, 0, 1, 1], [], []>} : vector<16x16xf32>, vector<16x8xf32>, vector<16x8xf32> -> vector<16x8xf32>
    %c8 = arith.constant 8 : index
    %c0_23 = arith.constant 0 : index
    %44 = vector.load %arg5[%c8, %c0_23] : memref<32x32xf32, #tpu.memory_space<vmem>>, vector<8x32xf32>
    %cst_24 = arith.constant dense<0.000000e+00> : vector<16x32xf32>
    %45 = tpu.matmul %43, %44, %cst_24 {dimension_numbers = #tpu.dot_dimension_numbers<[1], [0], [0], [1], [0, 0, 1, 1], [], []>} : vector<16x8xf32>, vector<8x32xf32>, vector<16x32xf32> -> vector<16x32xf32>
    %46 = arith.addf %27, %45 : vector<16x32xf32>
    %47 = vector.extract_strided_slice %7 {offsets = [0, 16], sizes = [16, 8], strides = [1, 1]} : vector<16x96xf32> to vector<16x8xf32>
    %48 = vector.extract_strided_slice %7 {offsets = [0, 48], sizes = [16, 8], strides = [1, 1]} : vector<16x96xf32> to vector<16x8xf32>
    %49 = vector.extract_strided_slice %7 {offsets = [0, 80], sizes = [16, 8], strides = [1, 1]} : vector<16x96xf32> to vector<16x8xf32>
    %cst_25 = arith.constant dense<0.000000e+00> : vector<16x16xf32>
    %50 = tpu.matmul %47, %48, %cst_25 {dimension_numbers = #tpu.dot_dimension_numbers<[1], [1], [0], [0], [0, 0, 1, 0], [], []>} : vector<16x8xf32>, vector<16x8xf32>, vector<16x16xf32> -> vector<16x16xf32>
    %cst_26 = arith.constant 0.353553385 : f32
    %51 = vector.broadcast %cst_26 : f32 to vector<16x16xf32>
    %52 = arith.mulf %50, %51 : vector<16x16xf32>
    %cst_27 = arith.constant dense<0xFF800000> : vector<16xf32>
    %53 = vector.multi_reduction <maximumf>, %52, %cst_27 [1] : vector<16x16xf32> to vector<16xf32>
    %54 = vector.shape_cast %53 : vector<16xf32> to vector<16x1xf32>
    %55 = vector.broadcast %54 : vector<16x1xf32> to vector<16x16xf32>
    %56 = arith.subf %52, %55 : vector<16x16xf32>
    %57 = math.exp %56 : vector<16x16xf32>
    %cst_28 = arith.constant dense<0.000000e+00> : vector<16xf32>
    %58 = vector.multi_reduction <add>, %57, %cst_28 [1] : vector<16x16xf32> to vector<16xf32>
    %59 = vector.shape_cast %58 : vector<16xf32> to vector<16x1xf32>
    %60 = vector.broadcast %59 : vector<16x1xf32> to vector<16x16xf32>
    %61 = arith.divf %57, %60 : vector<16x16xf32>
    %cst_29 = arith.constant dense<0.000000e+00> : vector<16x8xf32>
    %62 = tpu.matmul %61, %49, %cst_29 {dimension_numbers = #tpu.dot_dimension_numbers<[1], [0], [0], [1], [0, 0, 1, 1], [], []>} : vector<16x16xf32>, vector<16x8xf32>, vector<16x8xf32> -> vector<16x8xf32>
    %c16 = arith.constant 16 : index
    %c0_30 = arith.constant 0 : index
    %63 = vector.load %arg5[%c16, %c0_30] : memref<32x32xf32, #tpu.memory_space<vmem>>, vector<8x32xf32>
    %cst_31 = arith.constant dense<0.000000e+00> : vector<16x32xf32>
    %64 = tpu.matmul %62, %63, %cst_31 {dimension_numbers = #tpu.dot_dimension_numbers<[1], [0], [0], [1], [0, 0, 1, 1], [], []>} : vector<16x8xf32>, vector<8x32xf32>, vector<16x32xf32> -> vector<16x32xf32>
    %65 = arith.addf %46, %64 : vector<16x32xf32>
    %66 = vector.extract_strided_slice %7 {offsets = [0, 24], sizes = [16, 8], strides = [1, 1]} : vector<16x96xf32> to vector<16x8xf32>
    %67 = vector.extract_strided_slice %7 {offsets = [0, 56], sizes = [16, 8], strides = [1, 1]} : vector<16x96xf32> to vector<16x8xf32>
    %68 = vector.extract_strided_slice %7 {offsets = [0, 88], sizes = [16, 8], strides = [1, 1]} : vector<16x96xf32> to vector<16x8xf32>
    %cst_32 = arith.constant dense<0.000000e+00> : vector<16x16xf32>
    %69 = tpu.matmul %66, %67, %cst_32 {dimension_numbers = #tpu.dot_dimension_numbers<[1], [1], [0], [0], [0, 0, 1, 0], [], []>} : vector<16x8xf32>, vector<16x8xf32>, vector<16x16xf32> -> vector<16x16xf32>
    %cst_33 = arith.constant 0.353553385 : f32
    %70 = vector.broadcast %cst_33 : f32 to vector<16x16xf32>
    %71 = arith.mulf %69, %70 : vector<16x16xf32>
    %cst_34 = arith.constant dense<0xFF800000> : vector<16xf32>
    %72 = vector.multi_reduction <maximumf>, %71, %cst_34 [1] : vector<16x16xf32> to vector<16xf32>
    %73 = vector.shape_cast %72 : vector<16xf32> to vector<16x1xf32>
    %74 = vector.broadcast %73 : vector<16x1xf32> to vector<16x16xf32>
    %75 = arith.subf %71, %74 : vector<16x16xf32>
    %76 = math.exp %75 : vector<16x16xf32>
    %cst_35 = arith.constant dense<0.000000e+00> : vector<16xf32>
    %77 = vector.multi_reduction <add>, %76, %cst_35 [1] : vector<16x16xf32> to vector<16xf32>
    %78 = vector.shape_cast %77 : vector<16xf32> to vector<16x1xf32>
    %79 = vector.broadcast %78 : vector<16x1xf32> to vector<16x16xf32>
    %80 = arith.divf %76, %79 : vector<16x16xf32>
    %cst_36 = arith.constant dense<0.000000e+00> : vector<16x8xf32>
    %81 = tpu.matmul %80, %68, %cst_36 {dimension_numbers = #tpu.dot_dimension_numbers<[1], [0], [0], [1], [0, 0, 1, 1], [], []>} : vector<16x16xf32>, vector<16x8xf32>, vector<16x8xf32> -> vector<16x8xf32>
    %c24 = arith.constant 24 : index
    %c0_37 = arith.constant 0 : index
    %82 = vector.load %arg5[%c24, %c0_37] : memref<32x32xf32, #tpu.memory_space<vmem>>, vector<8x32xf32>
    %cst_38 = arith.constant dense<0.000000e+00> : vector<16x32xf32>
    %83 = tpu.matmul %81, %82, %cst_38 {dimension_numbers = #tpu.dot_dimension_numbers<[1], [0], [0], [1], [0, 0, 1, 1], [], []>} : vector<16x8xf32>, vector<8x32xf32>, vector<16x32xf32> -> vector<16x32xf32>
    %84 = arith.addf %65, %83 : vector<16x32xf32>
    %cst_39 = arith.constant dense<0.000000e+00> : vector<16xf32>
    %85 = vector.multi_reduction <add>, %84, %cst_39 [1] : vector<16x32xf32> to vector<16xf32>
    %86 = vector.shape_cast %85 : vector<16xf32> to vector<16x1xf32>
    %cst_40 = arith.constant 3.200000e+01 : f32
    %87 = vector.broadcast %cst_40 : f32 to vector<16x1xf32>
    %88 = arith.divf %86, %87 : vector<16x1xf32>
    %cst_41 = arith.constant 0.000000e+00 : f32
    %89 = vector.broadcast %cst_41 : f32 to vector<16x1xf32>
    %90 = arith.subf %89, %88 : vector<16x1xf32>
    %91 = math.exp %90 : vector<16x1xf32>
    %cst_42 = arith.constant 1.000000e+00 : f32
    %92 = vector.broadcast %cst_42 : f32 to vector<16x1xf32>
    %93 = arith.addf %92, %91 : vector<16x1xf32>
    %cst_43 = arith.constant 1.000000e+00 : f32
    %94 = vector.broadcast %cst_43 : f32 to vector<16x1xf32>
    %95 = arith.divf %94, %93 : vector<16x1xf32>
    %96 = vector.broadcast %95 : vector<16x1xf32> to vector<16x64xf32>
    %97 = arith.mulf %1, %96 : vector<16x64xf32>
    %c0_44 = arith.constant 0 : index
    %c0_45 = arith.constant 0 : index
    %c0_46 = arith.constant 0 : index
    %98 = vector.load %arg6[%c0_44, %c0_45, %c0_46] : memref<1x16x64xf32, #tpu.memory_space<vmem>>, vector<1x16x64xf32>
    %99 = vector.shape_cast %98 : vector<1x16x64xf32> to vector<16x64xf32>
    %100 = vector.shape_cast %97 : vector<16x64xf32> to vector<1x16x64xf32>
    tpu.vector_store %arg6[%c0_44, %c0_45, %c0_46], %100 {strides = array<i32>} : memref<1x16x64xf32, #tpu.memory_space<vmem>>, vector<1x16x64xf32>,
    return
  }
  func.func @transform_0(%arg0: i32) -> (i32, i32, i32) {
    %c0_i32 = arith.constant 0 : i32
    %c0_i32_0 = arith.constant 0 : i32
    %c0_i32_1 = arith.constant 0 : i32
    return %arg0, %c0_i32, %c0_i32_0 : i32, i32, i32
  }
  func.func @transform_1(%arg0: i32) -> (i32, i32) {
    %c0_i32 = arith.constant 0 : i32
    %c0_i32_0 = arith.constant 0 : i32
    %c0_i32_1 = arith.constant 0 : i32
    return %c0_i32, %c0_i32_0 : i32, i32
  }
  func.func @transform_2(%arg0: i32) -> (i32, i32) {
    %c0_i32 = arith.constant 0 : i32
    %c0_i32_0 = arith.constant 0 : i32
    %c0_i32_1 = arith.constant 0 : i32
    return %c0_i32, %c0_i32_0 : i32, i32
  }
  func.func @transform_3(%arg0: i32) -> (i32, i32) {
    %c0_i32 = arith.constant 0 : i32
    %c0_i32_0 = arith.constant 0 : i32
    %c0_i32_1 = arith.constant 0 : i32
    return %c0_i32, %c0_i32_0 : i32, i32
  }
  func.func @transform_4(%arg0: i32) -> (i32, i32) {
    %c0_i32 = arith.constant 0 : i32
    %c0_i32_0 = arith.constant 0 : i32
    %c0_i32_1 = arith.constant 0 : i32
    return %c0_i32, %c0_i32_0 : i32, i32
  }
  func.func @transform_5(%arg0: i32) -> (i32, i32, i32) {
    %c0_i32 = arith.constant 0 : i32
    %c0_i32_0 = arith.constant 0 : i32
    %c0_i32_1 = arith.constant 0 : i32
    return %arg0, %c0_i32, %c0_i32_0 : i32, i32, i32
  }
}

</mosaic_0001>

<bundles_post_ra>
// kernel: spatial_attention.1
= control target key start
LH: loop header
LB: loop body
LE: loop exit
PB: predicated region body
PF: predicated region fallthrough
CT: control target
= control target key end

     0   :  { %s1218_s18 = smov 0   ;;  %s1440_s0 = inlined_call_operand.vmem [shape: f32[2,16,64], index: 0, kind: input, shape index: {}]   ;;  %s1441_s1 = inlined_call_operand.vmem [shape: f32[64,32], index: 1, kind: input, shape index: {}]   ;;  %s1442_s2 = inlined_call_operand.vmem [shape: f32[16,32], index: 2, kind: input, shape index: {}]   ;;  %s1443_s3 = inlined_call_operand.vmem [shape: f32[32,96], index: 3, kind: input, shape index: {}]   ;;  %s1444_s4 = inlined_call_operand.vmem [shape: f32[32,32], index: 4, kind: input, shape index: {}]   ;;  %s1445_s5 = inlined_call_operand.vmem [shape: f32[2,16,64], index: 5, kind: output, shape index: {}]  }
   0x1 LB: > { %s1033_s19 = sadd.s32 4294967295, %s1174_s18   ;;  %p1037_p0 = scmp.ge.s32.totalorder %s1174_s18, 1  ;;  %s1174_s18 = sphi %s1218_s18, %s15_s18  }
   0x2   : > { %p187_p1 = scmp.lt.s32.totalorder %s1174_s18, 3 }
   0x4   : > { %p188_p2 = pnand %p1037_p0, %p187_p1 }
   0x5   : > { %p215_p3 = scmp.lt.s32.totalorder (!%p188_p2), %s1033_s19, 1  ;;  %s1176_s29 = smov (!%p188_p2), 96  }
   0x6   : > { %191 = sbr.rel (%p188_p2) target bundleno = 1781 (0x6f5), region = 40  ;;  %s1177_s30 = smov (!%p188_p2), 64  }
   0x7   : > { %s1178_s6 = smov (!%p188_p2), 120   ;;  %s1179_s7 = smov (!%p188_p2), 80  }
   0x8   : > { %s1180_s8 = smov (!%p188_p2), 72   ;;  %s1181_s10 = smov (!%p188_p2), 104  }
   0x9   : > { %s1182_s13 = smov (!%p188_p2), 88   ;;  %s1183_s14 = smov (!%p188_p2), 112  }
   0xa   : > { %s1184_s15 = smov (!%p188_p2), 56   ;;  %s1186_s17 = smov (!%p188_p2), 40  }
   0xb   : > { %v234_v0 = vld [vmem:[%s1441_s1 + $0x38] sm:$0xff]  ;;  %v233_v1 = vld [vmem:[%s1441_s1 + $0x30] sm:$0xff]  ;;  %v232_v2 = vld [vmem:[%s1441_s1 + $0x28] sm:$0xff]  ;;  %s1447_s19 = smov (!%p215_p3, %s1033_s19), 1  ;;  %vm237_vm0 = vcmask 523264   ;;  %vm271_vm1 = vcmask 261120  }
   0xc   : > { %252 = vmatpush.msra.mxu0 %v234_v0  ;;  %v270_v3 = vld [vmem:[%s1443_s3 + $0x18] sm:$0xff]  ;;  %v269_v4 = vld [vmem:[%s1443_s3 + $0x10] sm:$0xff]  ;;  %v231_v5 = vld [vmem:[%s1441_s1 + $0x20] sm:$0xff]  ;;  %s1080_s9 = sshll.u32 %s1447_s19, 4  ;;  %vm307_vm2 = vcmask 64512   ;;  %vm341_vm3 = vcmask 130048  }
   0xd   : > { %290 = vmatpush.msra.mxu1 %v270_v3  ;;  %1082 = vmatpush.msra.mxu2 %v270_v3  ;;  %v230_v6 = vld [vmem:[%s1441_s1 + $0x18] sm:$0xff]  ;;  %v229_v7 = vld [vmem:[%s1441_s1 + $0x10] sm:$0xff]  ;;  %v228_v8 = vld [vmem:[%s1441_s1 + $0x8] sm:$0xff]  ;;  %s219_s16 = scalar_lea.vmem %s1440_s0, %s1080_s9  ;;  %s224_s28 = scalar_lea.vmem %s1445_s5, %s1080_s9 }
   0xe   : > { %253 = vmatpush.msra.mxu0 %v233_v1  ;;  %v227_v9 = vld [vmem:[%s1441_s1] sm:$0xff]  ;;  %v1268_v11 = vld [vmem:[%s219_s16 + $0x8] sm:$0xff] }
   0xf   : > { %291 = vmatpush.msra.mxu1 %v269_v4  ;;  %1083 = vmatpush.msra.mxu2 %v269_v4  ;;  %v1264_v10 = vld [vmem:[%s219_s16] sm:$0xff]  ;;  %v268_v12 = vld [vmem:[%s1443_s3 + $0x8] sm:$0xff]  ;;  %s1185_s16 = smov 48  }
  0x10   : > { %254 = vmatpush.msra.mxu0 %v232_v2  ;;  %v267_v13 = vld [vmem:[%s1443_s3] sm:$0xff]  ;;  %v236_v17 = vld [vmem:[%s1442_s2 + $0x8] sm:$0xff] }
  0x11   : > { %292 = vmatpush.msra.mxu1 %v268_v12  ;;  %1084 = vmatpush.msra.mxu2 %v268_v12  ;;  %v235_v14 = vld [vmem:[%s1442_s2] sm:$0xff] }
  0x12   : > { %255 = vmatpush.msra.mxu0 %v231_v5  ;;  %v425_v25 = vld [vmem:[%s1444_s4] sm:$0xff] }
  0x13   : > { %293 = vmatpush.msra.mxu1 %v267_v13  ;;  %1085 = vmatpush.msra.mxu2 %v267_v13 }
  0x14   : > { %256 = vmatpush.msra.mxu0 %v230_v6 }
  0x16   : > { %257 = vmatpush.msra.mxu0 %v229_v7 }
  0x18   : > { %258 = vmatpush.msra.mxu0 %v228_v8 }
  0x1a   : > { %259 = vmatpush.msra.mxu0 %v227_v9 }
  0x1b   : > { %1042 = vmatmul.msk.f32.vlgmr.msra.gmra.mxu0 %vm237_vm0, %v1264_v10 }
  0x1c   : > { %601 = vmatpush.msrb.mxu0 %v425_v25 }
  0x23   : > { %1043 = vmatmul.msk.f32.gmra.mxu0 %vm237_vm0, %v1268_v11 }
  0x98   : > { %v261_v15 = vpop.f32.mrf.mxu0 }
  0x99   : > { %v262_v16 = vadd.f32 %v261_v15, %v235_v14 }
  0x9b   : > { %1044 = vmatmul.msk.f32.vlgmr.msra.gmra.mxu1 %vm271_vm1, %v262_v16 }
  0xa0   : > { %v264_v18 = vpop.f32.mrf.mxu0 }
  0xa1   : > { %v265_v19 = vadd.f32 %v264_v18, %v236_v17 }
  0xa3   : > { %1045 = vmatmul.msk.f32.vlgmr.msra.gmra.mxu2 %vm271_vm1, %v265_v19 }
 0x118   : > { %v1289_v21 = vpop.f32.mrf.mxu1 }
 0x126   : > { %v1286_v20 = vpop.f32.mrf.mxu2 }
 0x127   : > { %305 = vrot.lane.b32.xlu0 %v1286_v20, %s1176_s29  ;;  %v1294_v22 = vpack.i.bf16 %v1289_v21, %v1286_v20 }
 0x12f   : > { %303 = vrot.lane.b32.xlu0 %v1289_v21, %s1176_s29 }
 0x137   : > { %1107 = vrot.lane.b32.xlu0 %v1294_v22, %s1177_s30 }
 0x13f   : > { %426 = vrot.lane.b32.xlu0 %v1289_v21, %s1178_s6 }
 0x147   : > { %428 = vrot.lane.b32.xlu0 %v1286_v20, %s1178_s6 }
 0x14f   : > { %615 = vrot.lane.b32.xlu0 %v1286_v20, %s1179_s7 }
 0x157   : > { %771 = vrot.lane.b32.xlu0 %v1286_v20, %s1180_s8 }
 0x15f   : > { %765 = vrot.lane.b32.xlu0 %v1289_v21, %s1181_s10 }
 0x199   : > { %v306_v23 = vpop.permute.xlu0 %305 }
 0x19a   : > { %1046 = vmatpush.xpose.msk.msrb.mxu2 %vm307_vm2, %v306_v23 }
 0x1a1   : > { %v304_v24 = vpop.permute.xlu0 %303 }
 0x1a2   : > { %1047 = vmatpush.xpose.msk.msrb.mxu2 %vm307_vm2, %v304_v24 }
 0x1a5   : > { %1048 = vmatmul.msk.f32.vlgmr.msrb.gmra.mxu2 %vm307_vm2, %v1289_v21 }
 0x1a9   : > { %v1108_v26 = vpop.permute.xlu0 %1107 }
 0x1aa   : > { %v1109_v27 = vunpack.i.l.bf16 %v1108_v26  ;;  %v1110_v28 = vunpack.i.h.bf16 %v1108_v26 }
 0x1ac   : > { %416 = vmatpush.msra.mxu3 %v1109_v27 }
 0x1ad   : > { %1049 = vmatmul.msk.f32.gmra.mxu2 %vm307_vm2, %v1286_v20 }
 0x1ae   : > { %417 = vmatpush.msra.mxu3 %v1110_v28 }
 0x1b1   : > { %v1314_v29 = vpop.permute.xlu0 %426 }
 0x1b9   : > { %v1316_v30 = vpop.permute.xlu0 %428 }
 0x1c1   : > { %v1318_v31 = vpop.permute.xlu0 %615 }
 0x1c9   : > { %v772_v32 = vpop.permute.xlu0 %771 }
 0x1ca   : > { %1070 = vmatpush.xpose.msk.msra.mxu0 %vm307_vm2, %v772_v32 }
 0x1d1   : > { %v766_v19 = vpop.permute.xlu0 %765 }
 0x228   : > { %v333_v33 = vpop.f32.mrf.mxu2 }
 0x229   : > { %v339_v34 = vmul.f32 0.35355338, %v333_v33 }
 0x22b   : > { %v342_v35 = vsel %vm341_vm3, %v339_v34, -inf }
 0x22c   : > { %343 = vmax.xlane.f32.xlu1 %v342_v35 }
 0x230   : > { %v336_v36 = vpop.f32.mrf.mxu2 }
 0x231   : > { %v340_v37 = vmul.f32 0.35355338, %v336_v36 }
 0x233   : > { %v345_v38 = vsel %vm341_vm3, %v340_v37, -inf }
 0x234   : > { %346 = vmax.xlane.f32.xlu1 %v345_v38 }
 0x24d   : > { %432 = vrot.lane.b32.xlu1 %v1286_v20, %s1182_s13 }
 0x255   : > { %609 = vrot.lane.b32.xlu1 %v1289_v21, %s1183_s14 }
 0x25d   : > { %611 = vrot.lane.b32.xlu1 %v1286_v20, %s1183_s14 }
 0x29f   : > { %v344_v39 = vpop.xlane.xlu1 %343 }
 0x2a0   : > { %v348_v40 = vsub.f32 %v339_v34, %v344_v39 }
 0x2a2   : > { %v350_v41 = vmul.f32 1.442695, %v348_v40 }
 0x2a4   : > { %1126 = vpow2.f32 %v350_v41 }
 0x2a7   : > { %v347_v42 = vpop.xlane.xlu1 %346 }
 0x2a8   : > { %v349_v43 = vsub.f32 %v340_v37, %v347_v42 }
 0x2aa   : > { %v1127_v44 = vpop.eup %1126  ;;  %v352_v45 = vmul.f32 1.442695, %v349_v43 }
 0x2ab   : > { %v354_v46 = vsel %vm341_vm3, %v1127_v44, 0.0 }
 0x2ac   : > { %1128 = vpow2.f32 %v352_v45  ;;  %355 = vadd.xlane.f32.xlu2 %v354_v46 }
 0x2b2   : > { %v1129_v47 = vpop.eup %1128 }
 0x2b3   : > { %v357_v48 = vsel %vm341_vm3, %v1129_v47, 0.0 }
 0x2b4   : > { %358 = vadd.xlane.f32.xlu2 %v357_v48 }
 0x2bf   : > { %v433_v49 = vpop.permute.xlu1 %432 }
 0x2c0   : > { %1052 = vmatpush.xpose.msk.msrb.mxu3 %vm307_vm2, %v433_v49 }
 0x2c7   : > { %v610_v15 = vpop.permute.xlu1 %609 }
 0x2cc   : > { %430 = vrot.lane.b32.xlu2 %v1289_v21, %s1182_s13 }
 0x2cf   : > { %v612_v16 = vpop.permute.xlu1 %611 }
 0x2d4   : > { %613 = vrot.lane.b32.xlu2 %v1289_v21, %s1179_s7 }
 0x2dc   : > { %769 = vrot.lane.b32.xlu2 %v1289_v21, %s1180_s8 }
 0x2e4   : > { %767 = vrot.lane.b32.xlu2 %v1286_v20, %s1181_s10 }
 0x31f   : > { %v356_v50 = vpop.xlane.xlu2 %355 }
 0x320   : > { %1130 = vrcp.f32 %v356_v50  ;;  %v371_v55 = vand.u32 2147483648, %v356_v50  ;;  %v369_v57 = vand.u32 2147483647, %v356_v50  ;;  %vm365_vm5 = vweird.f32 %v356_v50 }
 0x322   : > { %v372_v60 = vor.u32 1.1754944e-38, %v371_v55  ;;  %vm370_vm7 = vcmp.eq.f32.partialorder %v369_v57, 8.507059e+37 }
 0x326   : > { %v1131_v51 = vpop.eup %1130 }
 0x327   : > { %v361_v52 = vmul.f32 %v1131_v51, %v356_v50  ;;  %v359_v53 = vpop.xlane.xlu2 %358  ;;  %vm366_vm4 = vweird.f32 %v1131_v51 }
 0x328   : > { %1132 = vrcp.f32 %v359_v53  ;;  %vm367_vm6 = vmor %vm365_vm5, %vm366_vm4  ;;  %v386_v3 = vand.u32 2147483648, %v359_v53  ;;  %v384_v5 = vand.u32 2147483647, %v359_v53  ;;  %vm380_vm9 = vweird.f32 %v359_v53 }
 0x329   : > { %v362_v54 = vsub.f32 1.0, %v361_v52 }
 0x32a   : > { %v387_v7 = vor.u32 1.1754944e-38, %v386_v3  ;;  %vm385_vm11 = vcmp.eq.f32.partialorder %v384_v5, 8.507059e+37 }
 0x32b   : > { %v363_v56 = vmul.f32 %v1131_v51, %v362_v54 }
 0x32d   : > { %v364_v58 = vadd.f32 %v1131_v51, %v363_v56 }
 0x32e   : > { %v1133_v59 = vpop.eup %1132 }
 0x32f   : > { %v376_v61 = vmul.f32 %v1133_v59, %v359_v53  ;;  %v431_v62 = vpop.permute.xlu2 %430  ;;  %v368_v63 = vsel %vm367_vm6, %v1131_v51, %v364_v58  ;;  %vm381_vm8 = vweird.f32 %v1133_v59 }
 0x330   : > { %1053 = vmatpush.xpose.msk.msrb.mxu3 %vm307_vm2, %v431_v62  ;;  %v373_v0 = vsel %vm370_vm7, %v372_v60, %v368_v63  ;;  %vm382_vm10 = vmor %vm380_vm9, %vm381_vm8 }
 0x331   : > { %v377_v1 = vsub.f32 1.0, %v376_v61  ;;  %v374_v2 = vmul.f32 %v1127_v44, %v373_v0 }
 0x333   : > { %v378_v4 = vmul.f32 %v1133_v59, %v377_v1  ;;  %1050 = vmatmul.msk.f32.vlgmr.msra.gmra.mxu3 %vm341_vm3, %v374_v2 }
 0x334   : > { %1062 = vmatpush.xpose.msk.msra.mxu3 %vm307_vm2, %v1318_v31 }
 0x335   : > { %v379_v6 = vadd.f32 %v1133_v59, %v378_v4 }
 0x337   : > { %v614_v8 = vpop.permute.xlu2 %613  ;;  %v383_v9 = vsel %vm382_vm10, %v1133_v59, %v379_v6 }
 0x338   : > { %1063 = vmatpush.xpose.msk.msra.mxu3 %vm307_vm2, %v614_v8  ;;  %v388_v12 = vsel %vm385_vm11, %v387_v7, %v383_v9 }
 0x339   : > { %v389_v13 = vmul.f32 %v1129_v47, %v388_v12 }
 0x33b   : > { %1051 = vmatmul.msk.f32.gmra.mxu3 %vm341_vm3, %v389_v13 }
 0x33f   : > { %v770_v14 = vpop.permute.xlu2 %769 }
 0x340   : > { %1071 = vmatpush.xpose.msk.msra.mxu0 %vm307_vm2, %v770_v14 }
 0x343   : > { %1054 = vmatmul.msk.f32.vlgmr.msrb.gmra.mxu3 %vm307_vm2, %v1314_v29 }
 0x347   : > { %v768_v24 = vpop.permute.xlu2 %767 }
 0x34b   : > { %1055 = vmatmul.msk.f32.gmra.mxu3 %vm307_vm2, %v1316_v30 }
 0x353   : > { %1064 = vmatmul.msk.f32.vlgmr.msra.gmra.mxu3 %vm307_vm2, %v610_v15 }
 0x35b   : > { %1065 = vmatmul.msk.f32.gmra.mxu3 %vm307_vm2, %v612_v16 }
 0x3b6   : > { %v419_v17 = vpop.f32.mrf.mxu3 }
 0x3b7   : > { %1060 = vmatmul.msk.f32.vlgmr.msrb.gmra.mxu0 %vm307_vm2, %v419_v17 }
 0x3be   : > { %v422_v18 = vpop.f32.mrf.mxu3 }
 0x3bf   : > { %1061 = vmatmul.msk.f32.gmra.mxu0 %vm307_vm2, %v422_v18 }
 0x3c6   : > { %v459_v20 = vpop.f32.mrf.mxu3 }
 0x3c7   : > { %v465_v21 = vmul.f32 0.35355338, %v459_v20  ;;  %1072 = vmatmul.msk.f32.vlgmr.msra.gmra.mxu0 %vm307_vm2, %v766_v19 }
 0x3c9   : > { %v467_v23 = vsel %vm341_vm3, %v465_v21, -inf }
 0x3ca   : > { %468 = vmax.xlane.f32.xlu1 %v467_v23 }
 0x3ce   : > { %v462_v25 = vpop.f32.mrf.mxu3 }
 0x3cf   : > { %v466_v26 = vmul.f32 0.35355338, %v462_v25  ;;  %1073 = vmatmul.msk.f32.gmra.mxu0 %vm307_vm2, %v768_v24 }
 0x3d1   : > { %v470_v27 = vsel %vm341_vm3, %v466_v26, -inf }
 0x3d2   : > { %471 = vmax.xlane.f32.xlu0 %v470_v27 }
 0x3d6   : > { %v642_v28 = vpop.f32.mrf.mxu3 }
 0x3d7   : > { %v648_v29 = vmul.f32 0.35355338, %v642_v28 }
 0x3d9   : > { %v650_v30 = vsel %vm341_vm3, %v648_v29, -inf }
 0x3da   : > { %651 = vmax.xlane.f32.xlu2 %v650_v30 }
 0x3de   : > { %v645_v31 = vpop.f32.mrf.mxu3 }
 0x3df   : > { %v649_v32 = vmul.f32 0.35355338, %v645_v31 }
 0x3e1   : > { %v653_v33 = vsel %vm341_vm3, %v649_v32, -inf }
 0x3e2   : > { %654 = vmax.xlane.f32.xlu2 %v653_v33 }
 0x434   : > { %v1357_v34 = vpop.f32.mrf.mxu0 }
 0x43c   : > { %v1359_v35 = vpop.f32.mrf.mxu0 }
 0x43d   : > { %v469_v36 = vpop.xlane.xlu1 %468 }
 0x43e   : > { %v473_v37 = vsub.f32 %v465_v21, %v469_v36 }
 0x440   : > { %v475_v38 = vmul.f32 1.442695, %v473_v37 }
 0x442   : > { %1134 = vpow2.f32 %v475_v38 }
 0x444   : > { %v798_v39 = vpop.f32.mrf.mxu0 }
 0x445   : > { %v804_v40 = vmul.f32 0.35355338, %v798_v39  ;;  %v472_v41 = vpop.xlane.xlu0 %471 }
 0x446   : > { %v474_v42 = vsub.f32 %v466_v26, %v472_v41 }
 0x447   : > { %v806_v43 = vsel %vm341_vm3, %v804_v40, -inf }
 0x448   : > { %v477_v44 = vmul.f32 1.442695, %v474_v42  ;;  %807 = vmax.xlane.f32.xlu1 %v806_v43  ;;  %v1362_v45 = vpop.eup %1134 }
 0x449   : > { %v479_v50 = vsel %vm341_vm3, %v1362_v45, 0.0 }
 0x44a   : > { %1136 = vpow2.f32 %v477_v44 }
 0x44c   : > { %v801_v46 = vpop.f32.mrf.mxu0 }
 0x44d   : > { %v805_v47 = vmul.f32 0.35355338, %v801_v46  ;;  %v652_v48 = vpop.xlane.xlu2 %651 }
 0x44e   : > { %v656_v49 = vsub.f32 %v648_v29, %v652_v48 }
 0x44f   : > { %v809_v51 = vsel %vm341_vm3, %v805_v47, -inf }
 0x450   : > { %v1367_v52 = vpop.eup %1136  ;;  %v658_v53 = vmul.f32 1.442695, %v656_v49  ;;  %480 = vadd.xlane.f32.xlu1 %v479_v50  ;;  %810 = vmax.xlane.f32.xlu0 %v809_v51 }
 0x451   : > { %v482_v54 = vsel %vm341_vm3, %v1367_v52, 0.0 }
 0x452   : > { %1138 = vpow2.f32 %v658_v53  ;;  %483 = vadd.xlane.f32.xlu2 %v482_v54 }
 0x455   : > { %v655_v55 = vpop.xlane.xlu2 %654 }
 0x456   : > { %v657_v56 = vsub.f32 %v649_v32, %v655_v55 }
 0x458   : > { %v1371_v57 = vpop.eup %1138  ;;  %v660_v58 = vmul.f32 1.442695, %v657_v56 }
 0x459   : > { %v662_v59 = vsel %vm341_vm3, %v1371_v57, 0.0 }
 0x45a   : > { %1140 = vpow2.f32 %v660_v58  ;;  %663 = vadd.xlane.f32.xlu0 %v662_v59 }
 0x460   : > { %v1375_v60 = vpop.eup %1140 }
 0x461   : > { %v665_v61 = vsel %vm341_vm3, %v1375_v60, 0.0 }
 0x462   : > { %666 = vadd.xlane.f32.xlu0 %v665_v61 }
 0x469   : > { %1112 = vrot.lane.b32.xlu1 %v1294_v22, %s1184_s15 }
 0x476   : > { %1117 = vrot.lane.b32.xlu0 %v1294_v22, %s1185_s16 }
 0x4bb   : > { %v808_v62 = vpop.xlane.xlu1 %807 }
 0x4bc   : > { %v812_v63 = vsub.f32 %v804_v40, %v808_v62 }
 0x4be   : > { %v814_v0 = vmul.f32 1.442695, %v812_v63 }
 0x4c0   : > { %1142 = vpow2.f32 %v814_v0 }
 0x4c3   : > { %v481_v1 = vpop.xlane.xlu1 %480  ;;  %v811_v2 = vpop.xlane.xlu0 %810 }
 0x4c4   : > { %1144 = vrcp.f32 %v481_v1  ;;  %v813_v3 = vsub.f32 %v805_v47, %v811_v2  ;;  %v496_v24 = vand.u32 2147483648, %v481_v1  ;;  %vm490_vm13 = vweird.f32 %v481_v1 }
 0x4c5   : > { %v484_v4 = vpop.xlane.xlu2 %483  ;;  %v494_v25 = vand.u32 2147483647, %v481_v1 }
 0x4c6   : > { %v1381_v5 = vpop.eup %1142  ;;  %v816_v6 = vmul.f32 1.442695, %v813_v3  ;;  %1146 = vrcp.f32 %v484_v4  ;;  %v497_v29 = vor.u32 1.1754944e-38, %v496_v24  ;;  %v511_v38 = vand.u32 2147483648, %v484_v4 }
 0x4c7   : > { %v818_v7 = vsel %vm341_vm3, %v1381_v5, 0.0  ;;  %vm495_vm15 = vcmp.eq.f32.partialorder %v494_v25, 8.507059e+37  ;;  %vm505_vm5 = vweird.f32 %v484_v4  ;;  %v509_v41 = vand.u32 2147483647, %v484_v4  ;;  %v733_v25 = vld [vmem:[%s1444_s4 + $0x10] sm:$0xff] }
 0x4c8   : > { %819 = vadd.xlane.f32.xlu2 %v818_v7  ;;  %1148 = vpow2.f32 %v816_v6  ;;  %v512_v46 = vor.u32 1.1754944e-38, %v511_v38  ;;  %v550_v6 = vld [vmem:[%s1444_s4 + $0x8] sm:$0xff] }
 0x4c9   : > { %vm510_vm7 = vcmp.eq.f32.partialorder %v509_v41, 8.507059e+37  ;;  %572 = vmatpush.msra.mxu2 %v550_v6 }
 0x4ca   : > { %v1145_v8 = vpop.eup %1144 }
 0x4cb   : > { %v486_v9 = vmul.f32 %v1145_v8, %v481_v1  ;;  %vm491_vm12 = vweird.f32 %v1145_v8  ;;  %755 = vmatpush.msrb.mxu2 %v733_v25 }
 0x4cc   : > { %v1147_v14 = vpop.eup %1146  ;;  %vm492_vm14 = vmor %vm490_vm13, %vm491_vm12 }
 0x4cd   : > { %v487_v12 = vsub.f32 1.0, %v486_v9  ;;  %v664_v13 = vpop.xlane.xlu0 %663  ;;  %v501_v18 = vmul.f32 %v1147_v14, %v484_v4  ;;  %vm506_vm4 = vweird.f32 %v1147_v14 }
 0x4ce   : > { %v1385_v15 = vpop.eup %1148  ;;  %1150 = vrcp.f32 %v664_v13  ;;  %vm507_vm6 = vmor %vm505_vm5, %vm506_vm4  ;;  %v679_v50 = vand.u32 2147483648, %v664_v13  ;;  %vm673_vm9 = vweird.f32 %v664_v13  ;;  %v677_v51 = vand.u32 2147483647, %v664_v13 }
 0x4cf   : > { %v821_v16 = vsel %vm341_vm3, %v1385_v15, 0.0  ;;  %v488_v17 = vmul.f32 %v1145_v8, %v487_v12  ;;  %v502_v20 = vsub.f32 1.0, %v501_v18 }
 0x4d0   : > { %822 = vadd.xlane.f32.xlu2 %v821_v16  ;;  %v680_v58 = vor.u32 1.1754944e-38, %v679_v50  ;;  %vm678_vm11 = vcmp.eq.f32.partialorder %v677_v51, 8.507059e+37 }
 0x4d1   : > { %v489_v19 = vadd.f32 %v1145_v8, %v488_v17  ;;  %v503_v26 = vmul.f32 %v1147_v14, %v502_v20 }
 0x4d3   : > { %v493_v28 = vsel %vm492_vm14, %v1145_v8, %v489_v19  ;;  %v504_v36 = vadd.f32 %v1147_v14, %v503_v26 }
 0x4d4   : > { %v1151_v23 = vpop.eup %1150  ;;  %v498_v32 = vsel %vm495_vm15, %v497_v29, %v493_v28 }
 0x4d5   : > { %v1389_v21 = vpop.xlane.xlu0 %666  ;;  %v669_v27 = vmul.f32 %v1151_v23, %v664_v13  ;;  %v499_v40 = vmul.f32 %v1362_v45, %v498_v32  ;;  %v508_v44 = vsel %vm507_vm6, %v1147_v14, %v504_v36  ;;  %vm674_vm8 = vweird.f32 %v1151_v23 }
 0x4d6   : > { %1152 = vrcp.f32 %v1389_v21  ;;  %v513_v47 = vsel %vm510_vm7, %v512_v46, %v508_v44  ;;  %vm675_vm10 = vmor %vm673_vm9, %vm674_vm8  ;;  %vm688_vm13 = vweird.f32 %v1389_v21  ;;  %v692_v0 = vand.u32 2147483647, %v1389_v21 }
 0x4d7   : > { %v670_v33 = vsub.f32 1.0, %v669_v27  ;;  %v514_v45 = vmul.f32 %v1367_v52, %v513_v47  ;;  %v694_v52 = vand.u32 2147483648, %v1389_v21 }
 0x4d8   : > { %vm693_vm15 = vcmp.eq.f32.partialorder %v692_v0, 8.507059e+37 }
 0x4d9   : > { %v671_v42 = vmul.f32 %v1151_v23, %v670_v33  ;;  %v695_v1 = vor.u32 1.1754944e-38, %v694_v52 }
 0x4db   : > { %v1113_v30 = vpop.permute.xlu1 %1112  ;;  %v672_v48 = vadd.f32 %v1151_v23, %v671_v42 }
 0x4dc   : > { %v1114_v31 = vunpack.i.l.bf16 %v1113_v30  ;;  %v1153_v37 = vpop.eup %1152  ;;  %v1115_v39 = vunpack.i.h.bf16 %v1113_v30 }
 0x4dd   : > { %v684_v43 = vmul.f32 %v1153_v37, %v1389_v21  ;;  %v676_v54 = vsel %vm675_vm10, %v1151_v23, %v672_v48  ;;  %vm689_vm12 = vweird.f32 %v1153_v37 }
 0x4de   : > { %541 = vmatpush.msrb.mxu1 %v1114_v31  ;;  %v681_v61 = vsel %vm678_vm11, %v680_v58, %v676_v54  ;;  %vm690_vm14 = vmor %vm688_vm13, %vm689_vm12 }
 0x4df   : > { %v685_v49 = vsub.f32 1.0, %v684_v43  ;;  %v682_v63 = vmul.f32 %v1371_v57, %v681_v61 }
 0x4e0   : > { %542 = vmatpush.msrb.mxu1 %v1115_v39 }
 0x4e1   : > { %1056 = vmatmul.msk.f32.vlgmr.msrb.gmra.mxu1 %vm341_vm3, %v499_v40  ;;  %v686_v55 = vmul.f32 %v1153_v37, %v685_v49 }
 0x4e3   : > { %v687_v62 = vadd.f32 %v1153_v37, %v686_v55 }
 0x4e8   : > { %v1118_v53 = vpop.permute.xlu0 %1117  ;;  %1122 = vrot.lane.b32.xlu2 %v1294_v22, %s1186_s17  ;;  %v691_v22 = vsel %vm690_vm14, %v1153_v37, %v687_v62  ;;  %v889_v37 = vld [vmem:[%s1444_s4 + $0x18] sm:$0xff] }
 0x4e9   : > { %v1119_v56 = vunpack.i.l.bf16 %v1118_v53  ;;  %1057 = vmatmul.msk.f32.gmra.mxu1 %vm341_vm3, %v514_v45  ;;  %v1120_v59 = vunpack.i.h.bf16 %v1118_v53  ;;  %v696_v2 = vsel %vm693_vm15, %v695_v1, %v691_v22 }
 0x4ea   : > { %v697_v3 = vmul.f32 %v1375_v60, %v696_v2 }
 0x4eb   : > { %724 = vmatpush.msra.mxu1 %v1119_v56 }
 0x4ed   : > { %725 = vmatpush.msra.mxu1 %v1120_v59  ;;  %v1187_v59 = vmov 32.0  }
 0x4ef   : > { %911 = vmatpush.msrb.mxu1 %v889_v37 }
 0x4f1   : > { %1066 = vmatmul.msk.f32.vlgmr.msra.gmra.mxu1 %vm341_vm3, %v682_v63 }
 0x4f9   : > { %1067 = vmatmul.msk.f32.gmra.mxu1 %vm341_vm3, %v697_v3 }
 0x53b   : > { %v820_v4 = vpop.xlane.xlu2 %819 }
 0x53c   : > { %1154 = vrcp.f32 %v820_v4  ;;  %v835_v13 = vand.u32 2147483648, %v820_v4  ;;  %v833_v14 = vand.u32 2147483647, %v820_v4  ;;  %vm829_vm5 = vweird.f32 %v820_v4 }
 0x53e   : > { %v836_v18 = vor.u32 1.1754944e-38, %v835_v13  ;;  %vm834_vm7 = vcmp.eq.f32.partialorder %v833_v14, 8.507059e+37 }
 0x542   : > { %v1155_v57 = vpop.eup %1154 }
 0x543   : > { %v825_v7 = vmul.f32 %v1155_v57, %v820_v4  ;;  %v823_v8 = vpop.xlane.xlu2 %822  ;;  %vm830_vm4 = vweird.f32 %v1155_v57 }
 0x544   : > { %1156 = vrcp.f32 %v823_v8  ;;  %vm831_vm6 = vmor %vm829_vm5, %vm830_vm4  ;;  %v850_v26 = vand.u32 2147483648, %v823_v8  ;;  %v848_v30 = vand.u32 2147483647, %v823_v8  ;;  %vm844_vm9 = vweird.f32 %v823_v8 }
 0x545   : > { %v826_v9 = vsub.f32 1.0, %v825_v7  ;;  %1158 = vrcp.f32 %v1187_v59 }
 0x546   : > { %v851_v32 = vor.u32 1.1754944e-38, %v850_v26  ;;  %vm849_vm11 = vcmp.eq.f32.partialorder %v848_v30, 8.507059e+37 }
 0x547   : > { %v827_v12 = vmul.f32 %v1155_v57, %v826_v9 }
 0x549   : > { %v828_v16 = vadd.f32 %v1155_v57, %v827_v12 }
 0x54a   : > { %v1157_v60 = vpop.eup %1156 }
 0x54b   : > { %v832_v17 = vsel %vm831_vm6, %v1155_v57, %v828_v16  ;;  %v840_v19 = vmul.f32 %v1157_v60, %v823_v8  ;;  %v1123_v20 = vpop.permute.xlu2 %1122  ;;  %vm845_vm8 = vweird.f32 %v1157_v60  ;;  %v1159_v61 = vpop.eup %1158 }
 0x54c   : > { %v837_v21 = vsel %vm834_vm7, %v836_v18, %v832_v17  ;;  %v1124_v23 = vunpack.i.l.bf16 %v1123_v20  ;;  %v1125_v27 = vunpack.i.h.bf16 %v1123_v20  ;;  %vm846_vm10 = vmor %vm844_vm9, %vm845_vm8  ;;  %v928_v62 = vmul.f32 32.0, %v1159_v61 }
 0x54d   : > { %v841_v24 = vsub.f32 1.0, %v840_v19  ;;  %v838_v29 = vmul.f32 %v1381_v5, %v837_v21 }
 0x54e   : > { %880 = vmatpush.msrb.mxu3 %v1124_v23 }
 0x54f   : > { %v842_v28 = vmul.f32 %v1157_v60, %v841_v24 }
 0x550   : > { %881 = vmatpush.msrb.mxu3 %v1125_v27 }
 0x551   : > { %1074 = vmatmul.msk.f32.vlgmr.msrb.gmra.mxu3 %vm341_vm3, %v838_v29  ;;  %v843_v31 = vadd.f32 %v1157_v60, %v842_v28 }
 0x553   : > { %v847_v33 = vsel %vm846_vm10, %v1157_v60, %v843_v31 }
 0x554   : > { %v852_v36 = vsel %vm849_vm11, %v851_v32, %v847_v33 }
 0x555   : > { %v853_v38 = vmul.f32 %v1385_v15, %v852_v36 }
 0x559   : > { %1075 = vmatmul.msk.f32.gmra.mxu3 %vm341_vm3, %v853_v38 }
 0x55e   : > { %v544_v5 = vpop.f32.mrf.mxu1 }
 0x55f   : > { %1058 = vmatmul.msk.f32.vlgmr.msra.gmra.mxu2 %vm307_vm2, %v544_v5 }
 0x566   : > { %v547_v39 = vpop.f32.mrf.mxu1 }
 0x567   : > { %1059 = vmatmul.msk.f32.gmra.mxu2 %vm307_vm2, %v547_v39 }
 0x56e   : > { %v727_v40 = vpop.f32.mrf.mxu1 }
 0x56f   : > { %1068 = vmatmul.msk.f32.vlgmr.msrb.gmra.mxu2 %vm307_vm2, %v727_v40 }
 0x576   : > { %v730_v41 = vpop.f32.mrf.mxu1 }
 0x577   : > { %1069 = vmatmul.msk.f32.gmra.mxu2 %vm307_vm2, %v730_v41 }
 0x5d4   : > { %v883_v42 = vpop.f32.mrf.mxu3 }
 0x5d5   : > { %1076 = vmatmul.msk.f32.vlgmr.msrb.gmra.mxu1 %vm307_vm2, %v883_v42 }
 0x5dc   : > { %v886_v43 = vpop.f32.mrf.mxu3 }
 0x5dd   : > { %1077 = vmatmul.msk.f32.gmra.mxu1 %vm307_vm2, %v886_v43  ;;  %vm932_vm2 = vweird.f32 %v1159_v61 }
 0x5e2   : > { %v574_v15 = vpop.f32.mrf.mxu2 }
 0x5e3   : > { %v604_v47 = vadd.f32 %v1357_v34, %v574_v15  ;;  %v929_v34 = vsub.f32 1.0, %v928_v62 }
 0x5e5   : > { %v930_v52 = vmul.f32 %v1159_v61, %v929_v34 }
 0x5e7   : > { %v931_v63 = vadd.f32 %v1159_v61, %v930_v52 }
 0x5e9   : > { %v933_v0 = vsel %vm932_vm2, %v1159_v61, %v931_v63 }
 0x5ea   : > { %v577_v44 = vpop.f32.mrf.mxu2 }
 0x5eb   : > { %v607_v53 = vadd.f32 %v1359_v35, %v577_v44 }
 0x5f2   : > { %v757_v46 = vpop.f32.mrf.mxu2 }
 0x5f3   : > { %v763_v48 = vadd.f32 %v757_v46, %v604_v47 }
 0x5fa   : > { %v760_v45 = vpop.f32.mrf.mxu2 }
 0x5fb   : > { %v764_v54 = vadd.f32 %v760_v45, %v607_v53 }
 0x652   : > { %v913_v49 = vpop.f32.mrf.mxu1 }
 0x653   : > { %v919_v50 = vadd.f32 %v913_v49, %v763_v48 }
 0x655   : > { %v921_v51 = vsel %vm271_vm1, %v919_v50, 0.0 }
 0x656   : > { %922 = vadd.xlane.f32.xlu1 %v921_v51 }
 0x65a   : > { %v916_v55 = vpop.f32.mrf.mxu1 }
 0x65b   : > { %v920_v56 = vadd.f32 %v916_v55, %v764_v54 }
 0x65d   : > { %v924_v58 = vsel %vm271_vm1, %v920_v56, 0.0 }
 0x65e   : > { %925 = vadd.xlane.f32.xlu0 %v924_v58 }
 0x6c9   : > { %v923_v22 = vpop.xlane.xlu1 %922 }
 0x6ca   : > { %v934_v1 = vmul.f32 %v933_v0, %v923_v22 }
 0x6cc   : > { %v936_v2 = vsub.f32 0.0, %v934_v1 }
 0x6ce   : > { %v938_v3 = vmul.f32 1.442695, %v936_v2 }
 0x6d0   : > { %1160 = vpow2.f32 %v938_v3 }
 0x6d1   : > { %v926_v35 = vpop.xlane.xlu0 %925 }
 0x6d2   : > { %v935_v4 = vmul.f32 %v933_v0, %v926_v35 }
 0x6d4   : > { %v937_v6 = vsub.f32 0.0, %v935_v4 }
 0x6d6   : > { %v1161_v57 = vpop.eup %1160  ;;  %v940_v7 = vmul.f32 1.442695, %v937_v6 }
 0x6d7   : > { %v942_v8 = vadd.f32 1.0, %v1161_v57 }
 0x6d8   : > { %1162 = vpow2.f32 %v940_v7 }
 0x6d9   : > { %1164 = vrcp.f32 %v942_v8  ;;  %v955_v60 = vand.u32 2147483648, %v942_v8  ;;  %v953_v18 = vand.u32 2147483647, %v942_v8  ;;  %vm949_vm3 = vweird.f32 %v942_v8 }
 0x6db   : > { %v956_v21 = vor.u32 1.1754944e-38, %v955_v60  ;;  %vm954_vm13 = vcmp.eq.f32.partialorder %v953_v18, 8.507059e+37 }
 0x6de   : > { %v1163_v9 = vpop.eup %1162 }
 0x6df   : > { %v1165_v12 = vpop.eup %1164  ;;  %v943_v13 = vadd.f32 1.0, %v1163_v9 }
 0x6e0   : > { %v945_v14 = vmul.f32 %v1165_v12, %v942_v8  ;;  %vm950_vm1 = vweird.f32 %v1165_v12 }
 0x6e1   : > { %1166 = vrcp.f32 %v943_v13  ;;  %vm951_vm12 = vmor %vm949_vm3, %vm950_vm1  ;;  %v970_v28 = vand.u32 2147483648, %v943_v13  ;;  %v968_v30 = vand.u32 2147483647, %v943_v13  ;;  %vm964_vm15 = vweird.f32 %v943_v13 }
 0x6e2   : > { %v946_v16 = vsub.f32 1.0, %v945_v14 }
 0x6e3   : > { %v971_v32 = vor.u32 1.1754944e-38, %v970_v28  ;;  %vm969_vm5 = vcmp.eq.f32.partialorder %v968_v30, 8.507059e+37 }
 0x6e4   : > { %v947_v17 = vmul.f32 %v1165_v12, %v946_v16 }
 0x6e6   : > { %v948_v19 = vadd.f32 %v1165_v12, %v947_v17 }
 0x6e7   : > { %v1167_v20 = vpop.eup %1166 }
 0x6e8   : > { %v952_v23 = vsel %vm951_vm12, %v1165_v12, %v948_v19  ;;  %v960_v24 = vmul.f32 %v1167_v20, %v943_v13  ;;  %vm965_vm14 = vweird.f32 %v1167_v20 }
 0x6e9   : > { %v957_v25 = vsel %vm954_vm13, %v956_v21, %v952_v23  ;;  %vm966_vm4 = vmor %vm964_vm15, %vm965_vm14 }
 0x6ea   : > { %v974_v26 = vmul.f32 %v957_v25, %v1264_v10  ;;  %v961_v27 = vsub.f32 1.0, %v960_v24 }
 0x6ec   : > { %976 = vst.msk [vmem:[%s224_s28] sm:$0xff] %vm237_vm0, %v974_v26  ;;  %v962_v29 = vmul.f32 %v1167_v20, %v961_v27 }
 0x6ee   : > { %v963_v31 = vadd.f32 %v1167_v20, %v962_v29 }
 0x6f0   : > { %v967_v33 = vsel %vm966_vm4, %v1167_v20, %v963_v31 }
 0x6f1   : > { %v972_v36 = vsel %vm969_vm5, %v971_v32, %v967_v33 }
 0x6f2   : > { %v975_v37 = vmul.f32 %v972_v36, %v1268_v11 }
 0x6f4   : > { %977 = vst.msk [vmem:[%s224_s28 + $0x8] sm:$0xff] %vm237_vm0, %v975_v37 }
 0x6f5 PF: > { %s15_s18 = sadd.s32 1, %s1174_s18  }
 0x6f6   : > { %p12_p4 = scmp.ge.s32.totalorder %s15_s18, 4  }
 0x6f8   :  { %14 = sbr.rel (!%p12_p4) target bundleno = 1 (0x1), region = 70 }

</bundles_post_ra>
